<compile_context>
chip_gen: v7x
topology: tpu7x:2x2x1
jax: 0.10.0
libtpu: 0.0.40
codegen_flags: <defaults>
</compile_context>

<pallas_src>
import functools

import jax
import jax.numpy as jnp
from jax.experimental import pallas as pl
from jax.experimental.pallas import tpu as pltpu

IN_F = 4
HID = 100
OUT_F = 4
HID_P = 128   # hidden dim zero-padded to the 128-lane vreg width
OUT_P = 128   # padded width of the last weight (output is stored narrow)

MAX_BLOCK_B = 4096  # v5e scoped-VMEM cap (16 MiB default on v5e)


def _round_up(n, m):
    return ((n + m - 1) // m) * m


def _mlp_kernel(x_ref, w1_ref, b1_ref, w2_ref, b2_ref,
                w3_ref, b3_ref, w4_ref, b4_ref, o_ref):
    # Dropout is identity in eval mode -> omitted.
    x = x_ref[...]                                    # (bb, 4) f32

    # Layer 1 on the VPU: K=4 would consume a full MXU push sequence for ~1%
    # of the FLOPs (vmatmul count scales with M/8 regardless of K).  Four
    # broadcast multiply-adds in f32 instead (VALU/XLU have slack here).
    h = b1_ref[...] + x[:, 0:1] * w1_ref[0:1, :]
    for k in range(1, IN_F):
        h = h + x[:, k:k + 1] * w1_ref[k:k + 1, :]
    h = jnp.maximum(h, 0.0)

    # Layers 2-4 on the MXU: bf16 operands, f32 accumulation; bias/ReLU f32.
    h = jnp.dot(h.astype(jnp.bfloat16), w2_ref[...],
                preferred_element_type=jnp.float32) + b2_ref[...]
    h = jnp.maximum(h, 0.0)
    h = jnp.dot(h.astype(jnp.bfloat16), w3_ref[...],
                preferred_element_type=jnp.float32) + b3_ref[...]
    h = jnp.maximum(h, 0.0)
    out = jnp.dot(h.astype(jnp.bfloat16), w4_ref[...],
                  preferred_element_type=jnp.float32)

    # Store only the OUT_F valid lanes -> narrow (B, 4) output, no padded
    # HBM writeback and no follow-up slice kernel.
    o_ref[...] = (out[:, :OUT_F] + b4_ref[...]).astype(o_ref.dtype)


def prepare_params(params):
    """One-time pad/cast of raw f32 nn.Linear-style params (hoisted out of
    the per-call forward).  w1 stays f32 (VPU layer); w2..w4 become bf16."""
    w1 = jnp.pad(params["w1"], ((0, 0), (0, HID_P - HID)))
    w2 = jnp.pad(params["w2"],
                 ((0, HID_P - HID), (0, HID_P - HID))).astype(jnp.bfloat16)
    w3 = jnp.pad(params["w3"],
                 ((0, HID_P - HID), (0, HID_P - HID))).astype(jnp.bfloat16)
    w4 = jnp.pad(params["w4"],
                 ((0, HID_P - HID), (0, OUT_P - OUT_F))).astype(jnp.bfloat16)
    b1 = jnp.pad(params["b1"], (0, HID_P - HID)).reshape(1, HID_P)
    b2 = jnp.pad(params["b2"], (0, HID_P - HID)).reshape(1, HID_P)
    b3 = jnp.pad(params["b3"], (0, HID_P - HID)).reshape(1, HID_P)
    b4 = params["b4"].reshape(1, OUT_F)
    return dict(w1=w1, b1=b1, w2=w2, b2=b2, w3=w3, b3=b3, w4=w4, b4=b4)


@functools.partial(jax.jit, static_argnames=("block_b",))
def kamp_dnn_forward(x, prepped, block_b=2048):
    """x: (B, 4) float32.  prepped: output of prepare_params()."""
    B = x.shape[0]

    # Batch tile: big enough to amortize per-step grid overhead, capped for
    # v5e scoped VMEM, clamped to give >= 2 grid steps when possible so the
    # "parallel" axis shards across both TensorCores on v7x.
    bb = min(_round_up(block_b, 8), MAX_BLOCK_B)
    bb = min(bb, _round_up(pl.cdiv(B, 2), 8))
    bb = max(bb, 8)
    grid = (pl.cdiv(B, bb),)

    # Advisory cost hint for XLA's scheduler (no effect on the kernel itself).
    flops = 2 * B * (IN_F * HID_P + 2 * HID_P * HID_P + HID_P * OUT_P)
    weight_bytes = (IN_F * HID_P * 4 + 3 * HID_P * HID_P * 2
                    + 3 * HID_P * 4 + OUT_F * 4)
    cost = pl.CostEstimate(flops=flops, transcendentals=0,
                           bytes_accessed=4 * B * (IN_F + OUT_F) + weight_bytes)

    # Weights / biases are grid-invariant full blocks (constant index_map):
    # Pallas keeps them resident in VMEM instead of re-DMA-ing per batch tile.
    full = lambda shape: pl.BlockSpec(shape, lambda i: (0, 0))

    return pl.pallas_call(
        _mlp_kernel,
        out_shape=jax.ShapeDtypeStruct((B, OUT_F), jnp.float32),
        grid_spec=pltpu.PrefetchScalarGridSpec(
            num_scalar_prefetch=0,
            grid=grid,
            in_specs=[
                pl.BlockSpec((bb, IN_F), lambda i: (i, 0)),   # x batch tile
                full((IN_F, HID_P)), full((1, HID_P)),        # layer1 (VPU)
                full((HID_P, HID_P)), full((1, HID_P)),       # layer2
                full((HID_P, HID_P)), full((1, HID_P)),       # layer3
                full((HID_P, OUT_P)), full((1, OUT_F)),       # layer4
            ],
            out_specs=pl.BlockSpec((bb, OUT_F), lambda i: (i, 0)),
        ),
        compiler_params=pltpu.CompilerParams(
            dimension_semantics=("parallel",)),
        cost_estimate=cost,
    )(x, prepped["w1"], prepped["b1"], prepped["w2"], prepped["b2"],
      prepped["w3"], prepped["b3"], prepped["w4"], prepped["b4"])


def init_params(key):
    """Deterministic init mimicking nn.Linear (uniform +/- 1/sqrt(fan_in))."""
    def linear(key, fan_in, fan_out):
        kw, kb = jax.random.split(key)
        bound = 1.0 / jnp.sqrt(jnp.float32(fan_in))
        w = jax.random.uniform(kw, (fan_in, fan_out), jnp.float32,
                               minval=-bound, maxval=bound)
        b = jax.random.uniform(kb, (fan_out,), jnp.float32,
                               minval=-bound, maxval=bound)
        return w, b

    k1, k2, k3, k4 = jax.random.split(key, 4)
    w1, b1 = linear(k1, IN_F, HID)
    w2, b2 = linear(k2, HID, HID)
    w3, b3 = linear(k3, HID, HID)
    w4, b4 = linear(k4, HID, OUT_F)
    return dict(w1=w1, b1=b1, w2=w2, b2=b2, w3=w3, b3=b3, w4=w4, b4=b4)


def reference_forward_f32(x, p):
    h = jnp.maximum(x @ p["w1"] + p["b1"], 0.0)
    h = jnp.maximum(h @ p["w2"] + p["b2"], 0.0)
    h = jnp.maximum(h @ p["w3"] + p["b3"], 0.0)
    return h @ p["w4"] + p["b4"]


def reference_forward_mixed(x, p):
    """Matches the kernel's precision recipe: layer1 in f32, layers 2-4 with
    bf16 operands and f32 accumulation."""
    def dot(a, w):
        return jnp.dot(a.astype(jnp.bfloat16), w.astype(jnp.bfloat16),
                       preferred_element_type=jnp.float32)
    h = jnp.maximum(x @ p["w1"] + p["b1"], 0.0)
    h = jnp.maximum(dot(h, p["w2"]) + p["b2"], 0.0)
    h = jnp.maximum(dot(h, p["w3"]) + p["b3"], 0.0)
    return dot(h, p["w4"]) + p["b4"]


if __name__ == "__main__":
    key = jax.random.PRNGKey(0)
    kx, kp = jax.random.split(key)

    B = 64  # small demo batch (multiple of 8)
    x = jax.random.normal(kx, (B, IN_F), jnp.float32)
    raw_params = init_params(kp)
    params = prepare_params(raw_params)   # one-time pad/cast (hoisted)

    # Default tile (clamped to >= 2 grid steps for this batch).
    out = jax.block_until_ready(kamp_dnn_forward(x, params))
    # Small-tile variant (exercises a 4-step grid / batch pipelining).
    out_tiled = jax.block_until_ready(kamp_dnn_forward(x, params, block_b=16))

    ref_mixed = reference_forward_mixed(x, raw_params)
    ref_f32 = reference_forward_f32(x, raw_params)

    assert out.shape == (B, OUT_F)
    assert jnp.allclose(out, out_tiled, atol=1e-5, rtol=1e-5), \
        "tiling changed results"
    assert jnp.allclose(out, ref_mixed, atol=2e-3, rtol=2e-3), \
        "mismatch vs matched mixed-precision reference"
    assert jnp.allclose(out, ref_f32, atol=5e-2, rtol=5e-2), \
        "mismatch vs f32 reference"

    print("KERNEL_OK")
</pallas_src>

<mosaic_0001>
module attributes {stable_mosaic.version = 11 : i64} {
  func.func @_mlp_kernel(%arg0: i32, %arg1: memref<32x4xf32, #tpu.memory_space<vmem>>, %arg2: memref<4x128xf32, #tpu.memory_space<vmem>>, %arg3: memref<1x128xf32, #tpu.memory_space<vmem>>, %arg4: memref<128x128xbf16, #tpu.memory_space<vmem>>, %arg5: memref<1x128xf32, #tpu.memory_space<vmem>>, %arg6: memref<128x128xbf16, #tpu.memory_space<vmem>>, %arg7: memref<1x128xf32, #tpu.memory_space<vmem>>, %arg8: memref<128x128xbf16, #tpu.memory_space<vmem>>, %arg9: memref<1x4xf32, #tpu.memory_space<vmem>>, %arg10: memref<32x4xf32, #tpu.memory_space<vmem>>) attributes {dimension_semantics = [#tpu.dimension_semantics<parallel>], iteration_bounds = array<i64: 2>, scalar_prefetch = 0 : i64, scratch_operands = 0 : i64, tpu.core_type = #tpu.core_type<tc>, window_params = [{transform_indices = @transform_0, window_bounds = array<i64: 32, 4>}, {pipeline_mode = #tpu.pipeline_mode<synchronous>, transform_indices = @transform_1, window_bounds = array<i64: 4, 128>}, {pipeline_mode = #tpu.pipeline_mode<synchronous>, transform_indices = @transform_2, window_bounds = array<i64: 1, 128>}, {pipeline_mode = #tpu.pipeline_mode<synchronous>, transform_indices = @transform_3, window_bounds = array<i64: 128, 128>}, {pipeline_mode = #tpu.pipeline_mode<synchronous>, transform_indices = @transform_4, window_bounds = array<i64: 1, 128>}, {pipeline_mode = #tpu.pipeline_mode<synchronous>, transform_indices = @transform_5, window_bounds = array<i64: 128, 128>}, {pipeline_mode = #tpu.pipeline_mode<synchronous>, transform_indices = @transform_6, window_bounds = array<i64: 1, 128>}, {pipeline_mode = #tpu.pipeline_mode<synchronous>, transform_indices = @transform_7, window_bounds = array<i64: 128, 128>}, {pipeline_mode = #tpu.pipeline_mode<synchronous>, transform_indices = @transform_8, window_bounds = array<i64: 1, 4>}, {transform_indices = @transform_9, window_bounds = array<i64: 32, 4>}]} {
    %c0 = arith.constant 0 : index
    %c0_0 = arith.constant 0 : index
    %0 = vector.load %arg1[%c0, %c0_0] : memref<32x4xf32, #tpu.memory_space<vmem>>, vector<32x4xf32>
    %c0_1 = arith.constant 0 : index
    %c0_2 = arith.constant 0 : index
    %1 = vector.load %arg3[%c0_1, %c0_2] : memref<1x128xf32, #tpu.memory_space<vmem>>, vector<1x128xf32>
    %2 = vector.extract_strided_slice %0 {offsets = [0, 0], sizes = [32, 1], strides = [1, 1]} : vector<32x4xf32> to vector<32x1xf32>
    %c0_3 = arith.constant 0 : index
    %c0_4 = arith.constant 0 : index
    %3 = vector.load %arg2[%c0_3, %c0_4] : memref<4x128xf32, #tpu.memory_space<vmem>>, vector<1x128xf32>
    %4 = vector.broadcast %2 : vector<32x1xf32> to vector<32x128xf32>
    %5 = vector.broadcast %3 : vector<1x128xf32> to vector<32x128xf32>
    %6 = arith.mulf %4, %5 : vector<32x128xf32>
    %7 = vector.broadcast %1 : vector<1x128xf32> to vector<32x128xf32>
    %8 = arith.addf %7, %6 : vector<32x128xf32>
    %9 = vector.extract_strided_slice %0 {offsets = [0, 1], sizes = [32, 1], strides = [1, 1]} : vector<32x4xf32> to vector<32x1xf32>
    %c1 = arith.constant 1 : index
    %c0_5 = arith.constant 0 : index
    %10 = vector.load %arg2[%c1, %c0_5] : memref<4x128xf32, #tpu.memory_space<vmem>>, vector<1x128xf32>
    %11 = vector.broadcast %9 : vector<32x1xf32> to vector<32x128xf32>
    %12 = vector.broadcast %10 : vector<1x128xf32> to vector<32x128xf32>
    %13 = arith.mulf %11, %12 : vector<32x128xf32>
    %14 = arith.addf %8, %13 : vector<32x128xf32>
    %15 = vector.extract_strided_slice %0 {offsets = [0, 2], sizes = [32, 1], strides = [1, 1]} : vector<32x4xf32> to vector<32x1xf32>
    %c2 = arith.constant 2 : index
    %c0_6 = arith.constant 0 : index
    %16 = vector.load %arg2[%c2, %c0_6] : memref<4x128xf32, #tpu.memory_space<vmem>>, vector<1x128xf32>
    %17 = vector.broadcast %15 : vector<32x1xf32> to vector<32x128xf32>
    %18 = vector.broadcast %16 : vector<1x128xf32> to vector<32x128xf32>
    %19 = arith.mulf %17, %18 : vector<32x128xf32>
    %20 = arith.addf %14, %19 : vector<32x128xf32>
    %21 = vector.extract_strided_slice %0 {offsets = [0, 3], sizes = [32, 1], strides = [1, 1]} : vector<32x4xf32> to vector<32x1xf32>
    %c3 = arith.constant 3 : index
    %c0_7 = arith.constant 0 : index
    %22 = vector.load %arg2[%c3, %c0_7] : memref<4x128xf32, #tpu.memory_space<vmem>>, vector<1x128xf32>
    %23 = vector.broadcast %21 : vector<32x1xf32> to vector<32x128xf32>
    %24 = vector.broadcast %22 : vector<1x128xf32> to vector<32x128xf32>
    %25 = arith.mulf %23, %24 : vector<32x128xf32>
    %26 = arith.addf %20, %25 : vector<32x128xf32>
    %cst = arith.constant 0.000000e+00 : f32
    %27 = vector.broadcast %cst : f32 to vector<32x128xf32>
    %28 = arith.maximumf %26, %27 : vector<32x128xf32>
    %29 = arith.truncf %28 : vector<32x128xf32> to vector<32x128xbf16>
    %c0_8 = arith.constant 0 : index
    %c0_9 = arith.constant 0 : index
    %30 = vector.load %arg4[%c0_8, %c0_9] : memref<128x128xbf16, #tpu.memory_space<vmem>>, vector<128x128xbf16>
    %cst_10 = arith.constant dense<0.000000e+00> : vector<32x128xf32>
    %31 = tpu.matmul %29, %30, %cst_10 {dimension_numbers = #tpu.dot_dimension_numbers<[1], [0], [0], [1], [0, 0, 1, 1], [], []>} : vector<32x128xbf16>, vector<128x128xbf16>, vector<32x128xf32> -> vector<32x128xf32>
    %c0_11 = arith.constant 0 : index
    %c0_12 = arith.constant 0 : index
    %32 = vector.load %arg5[%c0_11, %c0_12] : memref<1x128xf32, #tpu.memory_space<vmem>>, vector<1x128xf32>
    %33 = vector.broadcast %32 : vector<1x128xf32> to vector<32x128xf32>
    %34 = arith.addf %31, %33 : vector<32x128xf32>
    %cst_13 = arith.constant 0.000000e+00 : f32
    %35 = vector.broadcast %cst_13 : f32 to vector<32x128xf32>
    %36 = arith.maximumf %34, %35 : vector<32x128xf32>
    %37 = arith.truncf %36 : vector<32x128xf32> to vector<32x128xbf16>
    %c0_14 = arith.constant 0 : index
    %c0_15 = arith.constant 0 : index
    %38 = vector.load %arg6[%c0_14, %c0_15] : memref<128x128xbf16, #tpu.memory_space<vmem>>, vector<128x128xbf16>
    %cst_16 = arith.constant dense<0.000000e+00> : vector<32x128xf32>
    %39 = tpu.matmul %37, %38, %cst_16 {dimension_numbers = #tpu.dot_dimension_numbers<[1], [0], [0], [1], [0, 0, 1, 1], [], []>} : vector<32x128xbf16>, vector<128x128xbf16>, vector<32x128xf32> -> vector<32x128xf32>
    %c0_17 = arith.constant 0 : index
    %c0_18 = arith.constant 0 : index
    %40 = vector.load %arg7[%c0_17, %c0_18] : memref<1x128xf32, #tpu.memory_space<vmem>>, vector<1x128xf32>
    %41 = vector.broadcast %40 : vector<1x128xf32> to vector<32x128xf32>
    %42 = arith.addf %39, %41 : vector<32x128xf32>
    %cst_19 = arith.constant 0.000000e+00 : f32
    %43 = vector.broadcast %cst_19 : f32 to vector<32x128xf32>
    %44 = arith.maximumf %42, %43 : vector<32x128xf32>
    %45 = arith.truncf %44 : vector<32x128xf32> to vector<32x128xbf16>
    %c0_20 = arith.constant 0 : index
    %c0_21 = arith.constant 0 : index
    %46 = vector.load %arg8[%c0_20, %c0_21] : memref<128x128xbf16, #tpu.memory_space<vmem>>, vector<128x128xbf16>
    %cst_22 = arith.constant dense<0.000000e+00> : vector<32x128xf32>
    %47 = tpu.matmul %45, %46, %cst_22 {dimension_numbers = #tpu.dot_dimension_numbers<[1], [0], [0], [1], [0, 0, 1, 1], [], []>} : vector<32x128xbf16>, vector<128x128xbf16>, vector<32x128xf32> -> vector<32x128xf32>
    %48 = vector.extract_strided_slice %47 {offsets = [0, 0], sizes = [32, 4], strides = [1, 1]} : vector<32x128xf32> to vector<32x4xf32>
    %c0_23 = arith.constant 0 : index
    %c0_24 = arith.constant 0 : index
    %49 = vector.load %arg9[%c0_23, %c0_24] : memref<1x4xf32, #tpu.memory_space<vmem>>, vector<1x4xf32>
    %50 = vector.broadcast %49 : vector<1x4xf32> to vector<32x4xf32>
    %51 = arith.addf %48, %50 : vector<32x4xf32>
    %c0_25 = arith.constant 0 : index
    %c0_26 = arith.constant 0 : index
    %52 = vector.load %arg10[%c0_25, %c0_26] : memref<32x4xf32, #tpu.memory_space<vmem>>, vector<32x4xf32>
    tpu.vector_store %arg10[%c0_25, %c0_26], %51 {strides = array<i32>} : memref<32x4xf32, #tpu.memory_space<vmem>>, vector<32x4xf32>,
    return
  }
  func.func @transform_0(%arg0: i32) -> (i32, i32) {
    %c0_i32 = arith.constant 0 : i32
    %c0_i32_0 = arith.constant 0 : i32
    return %arg0, %c0_i32 : i32, i32
  }
  func.func @transform_1(%arg0: i32) -> (i32, i32) {
    %c0_i32 = arith.constant 0 : i32
    %c0_i32_0 = arith.constant 0 : i32
    %c0_i32_1 = arith.constant 0 : i32
    return %c0_i32, %c0_i32_0 : i32, i32
  }
  func.func @transform_2(%arg0: i32) -> (i32, i32) {
    %c0_i32 = arith.constant 0 : i32
    %c0_i32_0 = arith.constant 0 : i32
    %c0_i32_1 = arith.constant 0 : i32
    return %c0_i32, %c0_i32_0 : i32, i32
  }
  func.func @transform_3(%arg0: i32) -> (i32, i32) {
    %c0_i32 = arith.constant 0 : i32
    %c0_i32_0 = arith.constant 0 : i32
    %c0_i32_1 = arith.constant 0 : i32
    return %c0_i32, %c0_i32_0 : i32, i32
  }
  func.func @transform_4(%arg0: i32) -> (i32, i32) {
    %c0_i32 = arith.constant 0 : i32
    %c0_i32_0 = arith.constant 0 : i32
    %c0_i32_1 = arith.constant 0 : i32
    return %c0_i32, %c0_i32_0 : i32, i32
  }
  func.func @transform_5(%arg0: i32) -> (i32, i32) {
    %c0_i32 = arith.constant 0 : i32
    %c0_i32_0 = arith.constant 0 : i32
    %c0_i32_1 = arith.constant 0 : i32
    return %c0_i32, %c0_i32_0 : i32, i32
  }
  func.func @transform_6(%arg0: i32) -> (i32, i32) {
    %c0_i32 = arith.constant 0 : i32
    %c0_i32_0 = arith.constant 0 : i32
    %c0_i32_1 = arith.constant 0 : i32
    return %c0_i32, %c0_i32_0 : i32, i32
  }
  func.func @transform_7(%arg0: i32) -> (i32, i32) {
    %c0_i32 = arith.constant 0 : i32
    %c0_i32_0 = arith.constant 0 : i32
    %c0_i32_1 = arith.constant 0 : i32
    return %c0_i32, %c0_i32_0 : i32, i32
  }
  func.func @transform_8(%arg0: i32) -> (i32, i32) {
    %c0_i32 = arith.constant 0 : i32
    %c0_i32_0 = arith.constant 0 : i32
    %c0_i32_1 = arith.constant 0 : i32
    return %c0_i32, %c0_i32_0 : i32, i32
  }
  func.func @transform_9(%arg0: i32) -> (i32, i32) {
    %c0_i32 = arith.constant 0 : i32
    %c0_i32_0 = arith.constant 0 : i32
    return %arg0, %c0_i32 : i32, i32
  }
}

</mosaic_0001>

<bundles_post_ra>
// kernel: kamp_dnn_forward.1
= control target key start
LH: loop header
LB: loop body
LE: loop exit
PB: predicated region body
PF: predicated region fallthrough
CT: control target
= control target key end

     0   :  { %14 = vsyncpa [#allocation3], 0  ;;  %s1448_s0 = inlined_call_operand.vmem [shape: f32[64,4], index: 0, kind: input, shape index: {}]   ;;  %s1449_s1 = inlined_call_operand.vmem [shape: f32[4,128], index: 1, kind: input, shape index: {}]   ;;  %s1450_s2 = inlined_call_operand.vmem [shape: f32[1,128], index: 2, kind: input, shape index: {}]   ;;  %s1451_s3 = inlined_call_operand.vmem [shape: bf16[128,128], index: 3, kind: input, shape index: {}]   ;;  %s1452_s4 = inlined_call_operand.vmem [shape: f32[1,128], index: 4, kind: input, shape index: {}]   ;;  %s1453_s5 = inlined_call_operand.hbm [shape: bf16[128,128], index: 5, kind: input, shape index: {}]   ;;  %s1454_s6 = inlined_call_operand.vmem [shape: f32[1,128], index: 6, kind: input, shape index: {}]   ;;  %s1455_s7 = inlined_call_operand.hbm [shape: bf16[128,128], index: 7, kind: input, shape index: {}]   ;;  %s1456_s8 = inlined_call_operand.vmem [shape: f32[1,4], index: 8, kind: input, shape index: {}]   ;;  %s1457_s9 = inlined_call_operand.vmem [shape: f32[64,4], index: 9, kind: output, shape index: {}]  }
   0x1   :  { %15 = vsyncpa [#allocation5], 0  ;;  %s1297_s30 = smov 0  }
   0x2 LB: > { %s963_s10 = sadd.s32 4294967295, %s1237_s30   ;;  %p965_p0 = scmp.ge.s32.totalorder %s1237_s30, 1  ;;  %s1237_s30 = sphi %s1297_s30, %s21_s30  }
   0x3   : > { %p246_p1 = scmp.lt.s32.totalorder %s1237_s30, 3  ;;  %s1239_s11 = smov [#allocation2]  }
   0x4   : > { %s270_s12 = sshll.u32 %s1239_s11, 4  ;;  %p1311_p3 = scmp.eq.s32.totalorder %s963_s10, 0  ;;  %s271_s12 = int_to_ptr.vmem [resolvable:$true] %s270_s12 }
   0x5   : > { %p1305_p2 = pnand %p965_p0, %p246_p1  ;;  %s1240_s15 = smov [#allocation4]  }
   0x6   : > { %s1462_s14 = scalar_select %p1311_p3, 1, 0 }
   0x7   : > { %s1461_s13 = scalar_select %p1305_p2, 1, 0 }
   0x8   : > { %p1108_p4 = pneg %p1305_p2  ;;  %s286_s16 = sshll.u32 %s1240_s15, 4  ;;  %s1323_s16 = int_to_ptr.vmem [resolvable:$true] %s286_s16 }
   0x9   : > { %s1167_s20 = scalar_lea.hbm %s1453_s5, 1024 }
   0xa   : > { %p1319_p5 = pnand %p1311_p3, %p1108_p4  ;;  %p1168_p6 = scmp.ne.s32.totalorder %s1453_s5, %s1167_s20 }
   0xb   : > { %p1174_p10 = scmp.lt.u32.totalorder %s1167_s20, %s1453_s5 }
   0xc   : > { %p1169_p7 = pneg %p1319_p5 }
   0xe   : > { %p1170_p8 = pnand %p1169_p7, %p1168_p6 }
  0x10   : > { %p1171_p9 = pneg %p1170_p8 }
  0x12   : > { %p1176_p11 = pnand %p1174_p10, %p1171_p9 }
  0x14   : > { %1179 = shalt.err (!%p1176_p11)
}
  0x15   : > { %s1180_s25 = scalar_lea.vmem %s271_s12, 1024  ;;  %p1188_p1 = scmp.lt.s32.totalorder %s271_s12, %s271_s12 }
  0x16   : > { %p1181_p12 = scmp.ne.s32.totalorder %s271_s12, %s1180_s25  ;;  %p1189_p4 = scmp.lt.s32.totalorder %s1180_s25, %s1180_s25 }
  0x18   : > { %p1183_p13 = pnand %p1181_p12, %p1169_p7  ;;  %p1190_p3 = por %p1189_p4, %p1188_p1 }
  0x1a   : > { %p1184_p0 = pneg %p1183_p13 }
  0x1c   : > { %p1191_p2 = pnand %p1190_p3, %p1184_p0 }
  0x1e   : > { %1194 = shalt.err (!%p1191_p2)
}
  0x1f   : > { %s1241_s26 = smov 64   ;;  %s1242_s27 = smov 4  }
  0x20   : > { %1111 = dma.hbm_to_vmem [thread:$0]  (!%p1319_p5), %s1453_s5, 1024, %s271_s12, [#allocation3], %s1241_s26, %s1241_s26, %s1242_s27  }
  0x21   : > { %s1195_s18 = scalar_lea.hbm %s1455_s7, 1024 }
  0x22   : > { %p1196_p6 = scmp.ne.s32.totalorder %s1455_s7, %s1195_s18  ;;  %p1202_p8 = scmp.lt.u32.totalorder %s1195_s18, %s1455_s7 }
  0x24   : > { %p1198_p2 = pnand %p1196_p6, %p1169_p7 }
  0x26   : > { %p1199_p3 = pneg %p1198_p2 }
  0x28   : > { %p1204_p9 = pnand %p1202_p8, %p1199_p3 }
  0x2a   : > { %1207 = shalt.err (!%p1204_p9)
}
  0x2b   : > { %s1208_s12 = scalar_lea.vmem %s1323_s16, 1024  ;;  %p1216_p13 = scmp.lt.s32.totalorder %s1323_s16, %s1323_s16 }
  0x2c   : > { %p1209_p10 = scmp.ne.s32.totalorder %s1323_s16, %s1208_s12  ;;  %p1217_p0 = scmp.lt.s32.totalorder %s1208_s12, %s1208_s12 }
  0x2e   : > { %p1211_p11 = pnand %p1209_p10, %p1169_p7  ;;  %p1218_p1 = por %p1217_p0, %p1216_p13 }
  0x30   : > { %p1212_p12 = pneg %p1211_p11 }
  0x32   : > { %p1219_p4 = pnand %p1218_p1, %p1212_p12 }
  0x34   : > { %1222 = shalt.err (!%p1219_p4)
}
  0x35   : > { %1114 = dma.hbm_to_vmem [thread:$0]  (!%p1319_p5), %s1455_s7, 1024, %s1323_s16, [#allocation5], %s1241_s26, %s1241_s26, %s1242_s27  }
  0x36   : > { %p1464_p6 = scmp.ne.s32.totalorder %s1461_s13, 0 }
  0x37   : > { %p1465_p2 = scmp.ne.s32.totalorder (!%p1464_p6), %s1462_s14, 0 }
  0x38   : > { %314 = sbr.rel (%p1464_p6) target bundleno = 906 (0x38a), region = 56 }
  0x3f   : > { %1228 = dma.done.wait (%p1465_p2), [#allocation3], 1024  }
  0x40   : > { %1230 = vsyncadd (%p1465_p2), [#allocation3], 4294966272 }
  0x41   : > { %1232 = dma.done.wait (%p1465_p2), [#allocation5], 1024  }
  0x42   : > { %1234 = vsyncadd (%p1465_p2), [#allocation5], 4294966272  ;;  %s972_s17 = sshll.u32 %s963_s10, 2  ;;  %v1243_v0 = vmov 0   ;;  %v1244_v5 = vmov 1   ;;  %v1143_v6 = vld [vmem:[%s1451_s3] sm:$0xff]  }
  0x43   : > { %1136 = vset.pattern.permute.xlu1 %v1243_v0  ;;  %1135 = vset.pattern.permute.xlu0 %v1243_v0  ;;  %p355_p5 = scmp.lt.s32.totalorder %s972_s17, 7  ;;  %v1144_v7 = vld [vmem:[%s1451_s3 + $0x8] sm:$0xff]   ;;  %v1245_v8 = vmov 2   ;;  %v1145_v9 = vld [vmem:[%s1451_s3 + $0x10] sm:$0xff]   ;;  %v1146_v10 = vld [vmem:[%s1451_s3 + $0x18] sm:$0xff]   ;;  %v1246_v11 = vmov 3  }
  0x44   : > { %1040 = vmatprep.subr.bf16.mxu0 %v1143_v6  ;;  %v1147_v12 = vld [vmem:[%s1451_s3 + $0x20] sm:$0xff]   ;;  %v1148_v13 = vld [vmem:[%s1451_s3 + $0x28] sm:$0xff]   ;;  %v1149_v14 = vld [vmem:[%s1451_s3 + $0x30] sm:$0xff]   ;;  %vm880_vm0 = vcmask 31744  }
  0x45   : > { %s1467_s17 = smov (!%p355_p5, %s972_s17), 7  ;;  %1041 = vmatpush3.bf16.msra.mxu0 %v1143_v6  ;;  %v1150_v15 = vld [vmem:[%s1451_s3 + $0x38] sm:$0xff]   ;;  %v1151_v16 = vld [vmem:[#allocation2] sm:$0xff]   ;;  %v1152_v17 = vld [vmem:[#allocation2 + $0x8] sm:$0xff]  }
  0x46   : > { %s973_s13 = sshll.u32 %s1467_s17, 3  ;;  %1042 = vmatprep.subr.bf16.mxu0 %v1144_v7  ;;  %1060 = vmatprep.subr.bf16.mxu1 %v1151_v16  ;;  %v1153_v18 = vld [vmem:[#allocation2 + $0x10] sm:$0xff]   ;;  %v1154_v19 = vld [vmem:[#allocation2 + $0x18] sm:$0xff]   ;;  %v1155_v20 = vld [vmem:[#allocation2 + $0x20] sm:$0xff]  }
  0x47   : > { %s358_s26 = scalar_lea.vmem %s1448_s0, %s973_s13  ;;  %1061 = vmatpush3.bf16.msra.mxu1 %v1151_v16  ;;  %v1156_v21 = vld [vmem:[#allocation2 + $0x28] sm:$0xff]   ;;  %v976_v32 = vld [vmem:[%s1449_s1] ss:$0 sm:$0xff]  ;;  %v978_v35 = vld [vmem:[%s1449_s1 + $0x1] ss:$0 sm:$0xff]  ;;  %s364_s25 = scalar_lea.vmem %s1457_s9, %s973_s13 }
  0x48   : > { %v369_v1 = vld [vmem:[%s358_s26 + $0x10] sm:$0xff]  ;;  %v367_v2 = vld [vmem:[%s358_s26] sm:$0xff]  ;;  %v370_v3 = vld [vmem:[%s358_s26 + $0x18] sm:$0xff]  ;;  %1062 = vmatprep.subr.bf16.mxu1 %v1152_v17 }
  0x49   : > { %385 = vperm.xlu1 %1136, %v369_v1   ;;  %375 = vperm.xlu0 %1135, %v367_v2   ;;  %v368_v4 = vld [vmem:[%s358_s26 + $0x8] sm:$0xff]  ;;  %v977_v37 = vld [vmem:[%s1450_s2] ss:$0 sm:$0xff]  ;;  %v979_v38 = vld [vmem:[%s1449_s1 + $0x2] ss:$0 sm:$0xff] }
  0x4a   : > { %1043 = vmatpush3.bf16.msra.mxu0 %v1144_v7  ;;  %v980_v45 = vld [vmem:[%s1449_s1 + $0x3] ss:$0 sm:$0xff] }
  0x4b   : > { %1044 = vmatprep.subr.bf16.mxu0 %v1145_v9  ;;  %1063 = vmatpush3.bf16.msra.mxu1 %v1152_v17  ;;  %v1157_v17 = vld [vmem:[#allocation2 + $0x30] sm:$0xff]  }
  0x4c   : > { %1064 = vmatprep.subr.bf16.mxu1 %v1153_v18 }
  0x4d   : > { %390 = vperm.xlu1 %1136, %v370_v3   ;;  %380 = vperm.xlu0 %1135, %v368_v4  }
  0x4e   : > { %1045 = vmatpush3.bf16.msra.mxu0 %v1145_v9 }
  0x4f   : > { %1046 = vmatprep.subr.bf16.mxu0 %v1146_v10  ;;  %1065 = vmatpush3.bf16.msra.mxu1 %v1153_v18  ;;  %v1158_v18 = vld [vmem:[#allocation2 + $0x38] sm:$0xff]  }
  0x50   : > { %1066 = vmatprep.subr.bf16.mxu1 %v1154_v19 }
  0x51   : > { %1138 = vset.pattern.permute.xlu1 %v1244_v5  ;;  %1137 = vset.pattern.permute.xlu0 %v1244_v5 }
  0x52   : > { %417 = vperm.xlu1 %1138, %v368_v4   ;;  %413 = vperm.xlu0 %1137, %v367_v2  }
  0x53   : > { %1047 = vmatpush3.bf16.msra.mxu0 %v1146_v10  ;;  %1067 = vmatpush3.bf16.msra.mxu1 %v1154_v19  ;;  %v1159_v19 = vld [vmem:[#allocation4] sm:$0xff]  }
  0x54   : > { %1048 = vmatprep.subr.bf16.mxu0 %v1147_v12  ;;  %1068 = vmatprep.subr.bf16.mxu1 %v1155_v20 }
  0x56   : > { %421 = vperm.xlu1 %1138, %v369_v1   ;;  %425 = vperm.xlu0 %1137, %v370_v3  }
  0x57   : > { %1049 = vmatpush3.bf16.msra.mxu0 %v1147_v12  ;;  %1069 = vmatpush3.bf16.msra.mxu1 %v1155_v20  ;;  %v1160_v20 = vld [vmem:[#allocation4 + $0x8] sm:$0xff]  }
  0x58   : > { %1050 = vmatprep.subr.bf16.mxu0 %v1148_v13  ;;  %1070 = vmatprep.subr.bf16.mxu1 %v1156_v21 }
  0x5a   : > { %1139 = vset.pattern.permute.xlu1 %v1245_v8  ;;  %1140 = vset.pattern.permute.xlu0 %v1245_v8 }
  0x5b   : > { %442 = vperm.xlu1 %1139, %v367_v2   ;;  %446 = vperm.xlu0 %1140, %v368_v4  }
  0x5c   : > { %1051 = vmatpush3.bf16.msra.mxu0 %v1148_v13  ;;  %1071 = vmatpush3.bf16.msra.mxu1 %v1156_v21  ;;  %v1161_v21 = vld [vmem:[#allocation4 + $0x10] sm:$0xff]  }
  0x5d   : > { %1052 = vmatprep.subr.bf16.mxu0 %v1149_v14  ;;  %1072 = vmatprep.subr.bf16.mxu1 %v1157_v17 }
  0x5f   : > { %450 = vperm.xlu1 %1139, %v369_v1   ;;  %1141 = vset.pattern.permute.xlu0 %v1246_v11 }
  0x60   : > { %471 = vperm.xlu0 %1141, %v367_v2   ;;  %1053 = vmatpush3.bf16.msra.mxu0 %v1149_v14 }
  0x61   : > { %1054 = vmatprep.subr.bf16.mxu0 %v1150_v15  ;;  %1073 = vmatpush3.bf16.msra.mxu1 %v1157_v17 }
  0x62   : > { %1074 = vmatprep.subr.bf16.mxu1 %v1158_v18 }
  0x63   : > { %454 = vperm.xlu1 %1139, %v370_v3  }
  0x64   : > { %483 = vperm.xlu0 %1141, %v370_v3   ;;  %1055 = vmatpush3.bf16.msra.mxu0 %v1150_v15 }
  0x65   : > { %1075 = vmatpush3.bf16.msra.mxu1 %v1158_v18  ;;  %1080 = vmatprep.subr.bf16.mxu0 %v1159_v19 }
  0x67   : > { %1142 = vset.pattern.permute.xlu1 %v1246_v11 }
  0x68   : > { %475 = vperm.xlu1 %1142, %v368_v4  }
  0x6c   : > { %479 = vperm.xlu1 %1142, %v369_v1  }
  0xc8   : > { %v386_v22 = vpop.permute.xlu1 %385  ;;  %v376_v23 = vpop.permute.xlu0 %375 }
  0xc9   : > { %v397_v33 = vmul.f32 %v976_v32, %v376_v23  ;;  %v399_v49 = vmul.f32 %v976_v32, %v386_v22  ;;  %v1162_v22 = vld [vmem:[#allocation4 + $0x18] sm:$0xff]   ;;  %v1163_v23 = vld [vmem:[#allocation4 + $0x20] sm:$0xff]  }
  0xcb   : > { %v407_v40 = vadd.f32 %v977_v37, %v397_v33  ;;  %v409_v60 = vadd.f32 %v977_v37, %v399_v49 }
  0xcc   : > { %v391_v24 = vpop.permute.xlu1 %390  ;;  %v381_v25 = vpop.permute.xlu0 %380 }
  0xcd   : > { %v398_v34 = vmul.f32 %v976_v32, %v381_v25  ;;  %v400_v41 = vmul.f32 %v976_v32, %v391_v24  ;;  %v1164_v24 = vld [vmem:[#allocation4 + $0x28] sm:$0xff]   ;;  %v981_v25 = vld [vmem:[%s1452_s4] ss:$0 sm:$0xff] }
  0xcf   : > { %v408_v43 = vadd.f32 %v977_v37, %v398_v34  ;;  %v410_v51 = vadd.f32 %v977_v37, %v400_v41  ;;  %v1166_v41 = vld [vmem:[#allocation4 + $0x38] sm:$0xff]  }
  0xd1   : > { %v418_v26 = vpop.permute.xlu1 %417  ;;  %v414_v27 = vpop.permute.xlu0 %413 }
  0xd2   : > { %v432_v42 = vmul.f32 %v978_v35, %v414_v27  ;;  %v433_v44 = vmul.f32 %v978_v35, %v418_v26 }
  0xd4   : > { %v436_v52 = vadd.f32 %v432_v42, %v407_v40  ;;  %v437_v55 = vadd.f32 %v433_v44, %v408_v43  ;;  %v1165_v40 = vld [vmem:[#allocation4 + $0x30] sm:$0xff]   ;;  %v990_v42 = vld [vmem:[%s1454_s6] ss:$0 sm:$0xff] }
  0xd5   : > { %v422_v28 = vpop.permute.xlu1 %421  ;;  %v426_v29 = vpop.permute.xlu0 %425 }
  0xd6   : > { %v435_v46 = vmul.f32 %v978_v35, %v426_v29  ;;  %v434_v56 = vmul.f32 %v978_v35, %v422_v28 }
  0xd8   : > { %v439_v58 = vadd.f32 %v435_v46, %v410_v51  ;;  %v438_v4 = vadd.f32 %v434_v56, %v409_v60 }
  0xda   : > { %v443_v30 = vpop.permute.xlu1 %442  ;;  %v447_v31 = vpop.permute.xlu0 %446 }
  0xdb   : > { %v461_v47 = vmul.f32 %v979_v38, %v443_v30  ;;  %v462_v50 = vmul.f32 %v979_v38, %v447_v31 }
  0xdd   : > { %v465_v59 = vadd.f32 %v461_v47, %v436_v52  ;;  %v466_v61 = vadd.f32 %v462_v50, %v437_v55 }
  0xde   : > { %v451_v36 = vpop.permute.xlu1 %450 }
  0xdf   : > { %v472_v39 = vpop.permute.xlu0 %471  ;;  %v463_v62 = vmul.f32 %v979_v38, %v451_v36 }
  0xe0   : > { %v490_v53 = vmul.f32 %v980_v45, %v472_v39 }
  0xe1   : > { %v467_v6 = vadd.f32 %v463_v62, %v438_v4 }
  0xe2   : > { %v455_v48 = vpop.permute.xlu1 %454  ;;  %v494_v3 = vadd.f32 %v490_v53, %v465_v59 }
  0xe3   : > { %v464_v54 = vmul.f32 %v979_v38, %v455_v48  ;;  %v484_v57 = vpop.permute.xlu0 %483 }
  0xe4   : > { %v493_v1 = vmul.f32 %v980_v45, %v484_v57  ;;  %v498_v10 = vmax.f32 %v494_v3, 0.0  ;;  %v1007_v57 = vld [vmem:[%s1456_s8] ss:$0 sm:$0xff] }
  0xe5   : > { %v468_v0 = vadd.f32 %v464_v54, %v439_v58 }
  0xe7   : > { %v476_v63 = vpop.permute.xlu1 %475  ;;  %v497_v8 = vadd.f32 %v493_v1, %v468_v0 }
  0xe8   : > { %v491_v2 = vmul.f32 %v980_v45, %v476_v63 }
  0xe9   : > { %v501_v14 = vmax.f32 %v497_v8, 0.0 }
  0xea   : > { %v495_v5 = vadd.f32 %v491_v2, %v466_v61 }
  0xeb   : > { %v480_v7 = vpop.permute.xlu1 %479 }
  0xec   : > { %v492_v9 = vmul.f32 %v980_v45, %v480_v7  ;;  %v499_v11 = vmax.f32 %v495_v5, 0.0 }
  0xee   : > { %v496_v12 = vadd.f32 %v492_v9, %v467_v6  ;;  %v502_v13 = vpack.c.bf16 %v499_v11, %v498_v10 }
  0xf0   : > { %v500_v15 = vmax.f32 %v496_v12, 0.0  ;;  %1056 = vmatprep.mubr.bf16.mxu0 %v502_v13 }
  0xf2   : > { %v503_v16 = vpack.c.bf16 %v501_v14, %v500_v15 }
  0xf4   : > { %1057 = vmatmul.mubr.bf16.vlgmr.msra.gmra.mrb[0].mxu0 %v503_v16 }
  0xf5   : > { %1081 = vmatpush3.bf16.msra.mxu0 %v1159_v19 }
  0xf6   : > { %1082 = vmatprep.subr.bf16.mxu0 %v1160_v20 }
  0xf9   : > { %1083 = vmatpush3.bf16.msra.mxu0 %v1160_v20 }
  0xfa   : > { %1084 = vmatprep.subr.bf16.mxu0 %v1161_v21 }
  0xfd   : > { %1085 = vmatpush3.bf16.msra.mxu0 %v1161_v21 }
  0xfe   : > { %1086 = vmatprep.subr.bf16.mxu0 %v1162_v22 }
 0x101   : > { %1087 = vmatpush3.bf16.msra.mxu0 %v1162_v22 }
 0x102   : > { %1088 = vmatprep.subr.bf16.mxu0 %v1163_v23 }
 0x105   : > { %1089 = vmatpush3.bf16.msra.mxu0 %v1163_v23 }
 0x106   : > { %1090 = vmatprep.subr.bf16.mxu0 %v1164_v24 }
 0x109   : > { %1091 = vmatpush3.bf16.msra.mxu0 %v1164_v24 }
 0x10a   : > { %1092 = vmatprep.subr.bf16.mxu0 %v1165_v40 }
 0x10d   : > { %1093 = vmatpush3.bf16.msra.mxu0 %v1165_v40 }
 0x10e   : > { %1094 = vmatprep.subr.bf16.mxu0 %v1166_v41 }
 0x111   : > { %1095 = vmatpush3.bf16.msra.mxu0 %v1166_v41 }
 0x1c7   : > { %v1058_v26 = vpop.f32.mrb[0].mxu0 }
 0x1c8   : > { %v618_v27 = vadd.f32 %v1058_v26, %v981_v25  ;;  %v609_v28 = vpop.f32.mrb[1].mxu0 }
 0x1c9   : > { %v610_v29 = vadd.f32 %v981_v25, %v609_v28  ;;  %v1059_v30 = vpop.f32.mrb[2].mxu0 }
 0x1ca   : > { %v621_v31 = vadd.f32 %v1059_v30, %v981_v25  ;;  %v612_v32 = vpop.f32.mrb[3].mxu0  ;;  %v626_v34 = vmax.f32 %v618_v27, 0.0 }
 0x1cb   : > { %v613_v33 = vadd.f32 %v981_v25, %v612_v32  ;;  %v624_v36 = vmax.f32 %v610_v29, 0.0 }
 0x1cc   : > { %v627_v35 = vmax.f32 %v621_v31, 0.0 }
 0x1cd   : > { %v625_v37 = vmax.f32 %v613_v33, 0.0 }
 0x1ce   : > { %v629_v38 = vpack.c.bf16 %v627_v35, %v626_v34 }
 0x1cf   : > { %v628_v39 = vpack.c.bf16 %v625_v37, %v624_v36 }
 0x1d1   : > { %1076 = vmatprep.mubr.bf16.mxu1 %v628_v39 }
 0x1d2   : > { %1077 = vmatmul.mubr.bf16.vlgmr.msra.gmra.mrb[0].mxu1 %v629_v38 }
 0x2a5   : > { %v1078_v43 = vpop.f32.mrb[0].mxu1 }
 0x2a6   : > { %v744_v44 = vadd.f32 %v1078_v43, %v990_v42  ;;  %v735_v45 = vpop.f32.mrb[1].mxu1 }
 0x2a7   : > { %v736_v46 = vadd.f32 %v990_v42, %v735_v45  ;;  %v1079_v47 = vpop.f32.mrb[2].mxu1 }
 0x2a8   : > { %v747_v48 = vadd.f32 %v1079_v47, %v990_v42  ;;  %v738_v49 = vpop.f32.mrb[3].mxu1  ;;  %v752_v51 = vmax.f32 %v744_v44, 0.0 }
 0x2a9   : > { %v739_v50 = vadd.f32 %v990_v42, %v738_v49  ;;  %v750_v53 = vmax.f32 %v736_v46, 0.0 }
 0x2aa   : > { %v753_v52 = vmax.f32 %v747_v48, 0.0 }
 0x2ab   : > { %v751_v54 = vmax.f32 %v739_v50, 0.0 }
 0x2ac   : > { %v755_v55 = vpack.c.bf16 %v753_v52, %v752_v51 }
 0x2ad   : > { %v754_v56 = vpack.c.bf16 %v751_v54, %v750_v53 }
 0x2af   : > { %1096 = vmatprep.mubr.bf16.mxu0 %v754_v56 }
 0x2b0   : > { %1097 = vmatmul.mubr.bf16.vlgmr.msra.gmra.mrb[4].mxu0 %v755_v55 }
 0x383   : > { %v1098_v58 = vpop.f32.mrb[4].mxu0 }
 0x384   : > { %v854_v59 = vpop.f32.mrb[5].mxu0  ;;  %v878_v0 = vadd.f32 %v1098_v58, %v1007_v57 }
 0x385   : > { %v876_v60 = vadd.f32 %v1007_v57, %v854_v59  ;;  %v1099_v61 = vpop.f32.mrb[6].mxu0 }
 0x386   : > { %v857_v62 = vpop.f32.mrb[7].mxu0  ;;  %v879_v1 = vadd.f32 %v1099_v61, %v1007_v57  ;;  %883 = vst.msk [vmem:[%s364_s25 + $0x10] sm:$0xff] %vm880_vm0, %v878_v0 }
 0x387   : > { %881 = vst.msk [vmem:[%s364_s25] sm:$0xff] %vm880_vm0, %v876_v60  ;;  %v877_v63 = vadd.f32 %v1007_v57, %v857_v62 }
 0x388   : > { %884 = vst.msk [vmem:[%s364_s25 + $0x18] sm:$0xff] %vm880_vm0, %v879_v1 }
 0x389   : > { %882 = vst.msk [vmem:[%s364_s25 + $0x8] sm:$0xff] %vm880_vm0, %v877_v63 }
 0x38a PF: > { %s21_s30 = sadd.s32 1, %s1237_s30  }
 0x38b   : > { %p18_p7 = scmp.ge.s32.totalorder %s21_s30, 4  }
 0x38d   :  { %20 = sbr.rel (!%p18_p7) target bundleno = 2 (0x2), region = 95 }
 0x394   :  { %907 = vsyncpa [#allocation3], 1 }
 0x395   :  { %909 = vsyncpa [#allocation3 + $0x1], 1 }
 0x396   :  { %910 = vsyncpa [#allocation5], 1 }

</bundles_post_ra>
